<compile_context>
chip_gen: v6e
topology: v6e:2x2x1
jax: 0.10.0
libtpu: 0.0.40
codegen_flags: <defaults>
</compile_context>

<pallas_src>
import jax
import jax.numpy as jnp
from jax.experimental import pallas as pl
from jax.experimental.pallas import tpu as pltpu


def linear_kernel(w_ref, b_ref, xt_ref, ot_ref):
    # w_ref : (OUT, IN)  in SMEM   (PyTorch nn.Linear weight layout)
    # b_ref : (OUT,)     in SMEM
    # xt_ref: (IN, TB)   in VMEM   (x transposed: lane axis = batch)
    # ot_ref: (OUT, TB)  in VMEM   (lane-dense output slab)
    OUT, IN = w_ref.shape
    for o in range(OUT):                       # static, tiny (OUT = 1)
        row = w_ref[o, 0] * xt_ref[0:1, :]     # scalar-broadcast VPU mul
        for i in range(1, IN):                 # static, tiny (IN = 2)
            row = row + w_ref[o, i] * xt_ref[i:i + 1, :]
        ot_ref[o:o + 1, :] = (row + b_ref[o]).astype(ot_ref.dtype)


def simple_model_forward(x, weight, bias, *, batch_tile=512):
    """y = x @ weight.T + bias  (matches torch nn.Linear semantics)."""
    B, IN = x.shape
    OUT, IN_w = weight.shape
    assert IN == IN_w and bias.shape == (OUT,)

    LANE = 128
    # Pad batch (lane axis) to a multiple of 128 so every store is unmasked,
    # then pick a tile size TB <= batch_tile that evenly divides the padding.
    b_pad = ((B + LANE - 1) // LANE) * LANE
    tb = min(batch_tile, b_pad)
    b_pad = ((b_pad + tb - 1) // tb) * tb

    # Layout plumbing (not compute): batch onto the lane axis, zero-pad.
    xt = jnp.pad(x.T, ((0, 0), (0, b_pad - B)))           # (IN, b_pad)

    ot = pl.pallas_call(
        linear_kernel,
        out_shape=jax.ShapeDtypeStruct((OUT, b_pad), x.dtype),
        grid_spec=pltpu.PrefetchScalarGridSpec(
            num_scalar_prefetch=0,
            grid=(b_pad // tb,),
            in_specs=[
                # tiny constants -> SMEM scalars, no (8,128) VMEM tile padding
                pl.BlockSpec(memory_space=pltpu.MemorySpace.SMEM),  # weight
                pl.BlockSpec(memory_space=pltpu.MemorySpace.SMEM),  # bias
                pl.BlockSpec((IN, tb), lambda b: (0, b)),           # x^T tile
            ],
            out_specs=pl.BlockSpec((OUT, tb), lambda b: (0, b)),
        ),
        compiler_params=pltpu.CompilerParams(
            dimension_semantics=("parallel",),   # batch axis shards across TCs
        ),
    )(weight, bias, xt)

    # Drop batch padding, return PyTorch layout (B, OUT).
    return ot[:, :B].T


if __name__ == "__main__":
    key = jax.random.PRNGKey(0)
    kw, kb = jax.random.split(key)

    # nn.Linear(2, 1): weight (1, 2), bias (1,) — deterministic synthetic init
    # in PyTorch's default range [-1/sqrt(fan_in), 1/sqrt(fan_in)].
    bound = 1.0 / jnp.sqrt(2.0)
    weight = jax.random.uniform(kw, (1, 2), jnp.float32, -bound, bound)
    bias = jax.random.uniform(kb, (1,), jnp.float32, -bound, bound)

    # Same input as the PyTorch script: x = [[1, 2], [3, 4]]
    x = jnp.array([[1.0, 2.0], [3.0, 4.0]], dtype=jnp.float32)

    out = simple_model_forward(x, weight, bias)
    out = jax.block_until_ready(out)

    # Correctness check against a plain-JAX reference.
    ref = x @ weight.T + bias
    assert out.shape == (2, 1)
    assert jnp.allclose(out, ref, atol=1e-5, rtol=1e-5)

    print("KERNEL_OK")
</pallas_src>

<mosaic_0001>
module attributes {stable_mosaic.version = 11 : i64} {
  func.func @linear_kernel(%arg0: i32, %arg1: memref<1x2xf32, #tpu.memory_space<smem>>, %arg2: memref<1xf32, #tpu.memory_space<smem>>, %arg3: memref<2x128xf32, #tpu.memory_space<vmem>>, %arg4: memref<1x128xf32, #tpu.memory_space<vmem>>) attributes {dimension_semantics = [#tpu.dimension_semantics<parallel>], iteration_bounds = array<i64: 1>, scalar_prefetch = 0 : i64, scratch_operands = 0 : i64, tpu.core_type = #tpu.core_type<tc>, window_params = [{transform_indices = @transform_0, window_bounds = array<i64: 1, 2>}, {transform_indices = @transform_1, window_bounds = array<i64: 1>}, {transform_indices = @transform_2, window_bounds = array<i64: 2, 128>}, {transform_indices = @transform_3, window_bounds = array<i64: 1, 128>}]} {
    %c0 = arith.constant 0 : index
    %c0_0 = arith.constant 0 : index
    %0 = memref.load %arg1[%c0, %c0_0] : memref<1x2xf32, #tpu.memory_space<smem>>
    %c0_1 = arith.constant 0 : index
    %c0_2 = arith.constant 0 : index
    %1 = vector.load %arg3[%c0_1, %c0_2] : memref<2x128xf32, #tpu.memory_space<vmem>>, vector<1x128xf32>
    %2 = vector.broadcast %0 : f32 to vector<1x128xf32>
    %3 = arith.mulf %2, %1 : vector<1x128xf32>
    %c0_3 = arith.constant 0 : index
    %c1 = arith.constant 1 : index
    %4 = memref.load %arg1[%c0_3, %c1] : memref<1x2xf32, #tpu.memory_space<smem>>
    %c1_4 = arith.constant 1 : index
    %c0_5 = arith.constant 0 : index
    %5 = vector.load %arg3[%c1_4, %c0_5] : memref<2x128xf32, #tpu.memory_space<vmem>>, vector<1x128xf32>
    %6 = vector.broadcast %4 : f32 to vector<1x128xf32>
    %7 = arith.mulf %6, %5 : vector<1x128xf32>
    %8 = arith.addf %3, %7 : vector<1x128xf32>
    %c0_6 = arith.constant 0 : index
    %9 = memref.load %arg2[%c0_6] : memref<1xf32, #tpu.memory_space<smem>>
    %10 = vector.broadcast %9 : f32 to vector<1x128xf32>
    %11 = arith.addf %8, %10 : vector<1x128xf32>
    %c0_7 = arith.constant 0 : index
    %c0_8 = arith.constant 0 : index
    %12 = vector.load %arg4[%c0_7, %c0_8] : memref<1x128xf32, #tpu.memory_space<vmem>>, vector<1x128xf32>
    tpu.vector_store %arg4[%c0_7, %c0_8], %11 {strides = array<i32>} : memref<1x128xf32, #tpu.memory_space<vmem>>, vector<1x128xf32>,
    return
  }
  func.func @transform_0(%arg0: i32) -> (i32, i32) {
    %c0_i32 = arith.constant 0 : i32
    %c0_i32_0 = arith.constant 0 : i32
    %c0_i32_1 = arith.constant 0 : i32
    return %c0_i32, %c0_i32_0 : i32, i32
  }
  func.func @transform_1(%arg0: i32) -> i32 {
    %c0_i32 = arith.constant 0 : i32
    %c0_i32_0 = arith.constant 0 : i32
    return %c0_i32 : i32
  }
  func.func @transform_2(%arg0: i32) -> (i32, i32) {
    %c0_i32 = arith.constant 0 : i32
    %c0_i32_0 = arith.constant 0 : i32
    return %c0_i32, %arg0 : i32, i32
  }
  func.func @transform_3(%arg0: i32) -> (i32, i32) {
    %c0_i32 = arith.constant 0 : i32
    %c0_i32_0 = arith.constant 0 : i32
    return %c0_i32, %arg0 : i32, i32
  }
}

</mosaic_0001>

<bundles_post_ra>
// kernel: tpu_custom_call.1
= control target key start
LH: loop header
LB: loop body
LE: loop exit
PB: predicated region body
PF: predicated region fallthrough
CT: control target
= control target key end

     0   :  { %9 = vsyncpa [#allocation5], 0  ;;  %s133_s0 = inlined_call_operand.vmem [shape: f32[1,2], index: 0, kind: input, shape index: {}]   ;;  %s134_s1 = inlined_call_operand.<no memory space> [shape: f32[1], index: 1, kind: input, shape index: {}]   ;;  %s135_s2 = inlined_call_operand.vmem [shape: f32[2,128], index: 2, kind: input, shape index: {}]   ;;  %s136_s3 = inlined_call_operand.hbm [shape: f32[1,128], index: 3, kind: output, shape index: {}]  }
   0x1   :  { %10 = vsyncpa [#allocation4], 0  ;;  %s17_s14 = sshll.u32 %s133_s0, 4  ;;  %s18_s14 = int_to_ptr.vmem [resolvable:$true] %s17_s14 }
   0x2   :  { %s60_s15 = scalar_lea.vmem %s18_s14, 16  ;;  %p65_p1 = scmp.lt.s32.totalorder %s18_s14, %s18_s14 }
   0x3   :  { %p61_p0 = scmp.ne.s32.totalorder %s18_s14, %s60_s15  ;;  %p66_p2 = scmp.lt.s32.totalorder %s60_s15, %s60_s15 }
   0x5   :  { %p67_p3 = por %p66_p2, %p65_p1 }
   0x7   :  { %p68_p4 = pnand %p67_p3, %p61_p0 }
   0x9   :  { %71 = shalt.err (!%p68_p4)
}
   0xa   :  { %s96_s16 = smov [#allocation3]  }
   0xb   :  { %20 = dma.vmem_to_smem %s18_s14, 16, %s96_s16, [#allocation5]  }
   0xc   :  { %92 = dma.done.wait [#allocation5], 16  }
   0xd   :  { %93 = vsyncadd [#allocation5], 4294967280 }
   0xe   :  { %28 = sfence }
   0xf   :  { %s29_s17 = sld [smem:[#allocation3]]  ;;  %v30_v0 = vld [vmem:[%s135_s2] sm:$0x1]  ;;  %v34_v1 = vld [vmem:[%s135_s2 + $0x1] sm:$0x1]  ;;  %v39_v6 = vstv %s134_s1  ;;  %s97_s24 = smov [#allocation6]  }
  0x10   :  { %s57_s18 = sld [smem:[#allocation3 + $0x1]]  ;;  %s48_s25 = sshll.u32 %s97_s24, 4  ;;  %s49_s25 = int_to_ptr.vmem [resolvable:$true] %s48_s25 }
  0x11   :  { %s72_s26 = scalar_lea.vmem %s49_s25, 16  ;;  %s76_s27 = scalar_lea.vmem %s49_s25, 32 }
  0x12   :  { %p73_p5 = scmp.ne.s32.totalorder %s49_s25, %s72_s26  ;;  %p77_p6 = scmp.lt.s32.totalorder %s49_s25, %s49_s25 }
  0x13   :  { %p78_p7 = scmp.lt.s32.totalorder %s76_s27, %s72_s26 }
  0x15   :  { %v31_v2 = vstv %s29_s17  ;;  %p79_p8 = por %p78_p7, %p77_p6 }
  0x16   :  { %v32_v3 = vmul.f32 %v31_v2, %v30_v0  ;;  %v35_v4 = vstv %s57_s18 }
  0x17   :  { %v36_v5 = vmul.f32 %v35_v4, %v34_v1  ;;  %p80_p9 = pnand %p79_p8, %p73_p5 }
  0x19   :  { %v37_v7 = vadd.f32 %v36_v5, %v32_v3 }
  0x1b   :  { %v40_v8 = vadd.f32 %v39_v6, %v37_v7 }
  0x1d   :  { %41 = vst [vmem:[#allocation6] sm:$0x1] %v40_v8 }
  0x1e   :  { %83 = shalt.err (!%p80_p9)
}
  0x1f   :  { %51 = dma.vmem_to_hbm [thread:$0]  %s49_s25, 16, %s136_s3, [#allocation4]  }
  0x20   :  { %94 = dma.done.wait [#allocation4], 16  }
  0x21   :  { %95 = vsyncadd [#allocation4], 4294967280 }
  0x22   :  { %55 = vsyncpa [#allocation4], 1 }
  0x23   :  { %56 = vsyncpa [#allocation5], 1 }

</bundles_post_ra>
